<compile_context>
chip_gen: v7x
topology: tpu7x:2x2x1
jax: 0.10.0
libtpu: 0.0.40
codegen_flags: <defaults>
</compile_context>

<pallas_src>
import functools
import math

import numpy as np
import jax
import jax.numpy as jnp
from jax.experimental import pallas as pl
from jax.experimental.pallas import tpu as pltpu


def _round_up(x, m):
    return ((x + m - 1) // m) * m


def _divisor_tile(total, cap, align=128):
    """Largest multiple of `align` that divides `total` and is <= cap."""
    t = max(align, (min(cap, total) // align) * align)
    while total % t:
        t -= align
    return t


# ----------------------------------------------------------------------------
# Fused Pallas kernels:  out = maybe_relu( (X @ W_scaled) + shift )
# ----------------------------------------------------------------------------
def _matmul_bias_kernel_acc(x_ref, w_ref, shift_ref, o_ref, acc_ref, *, relu):
    """bf16 (narrow) output: accumulate in an f32 VMEM scratch, cast at end."""
    @pl.when(pl.program_id(2) == 0)
    def _init():
        acc_ref[...] = jnp.zeros_like(acc_ref)

    acc_ref[...] += jnp.dot(x_ref[...], w_ref[...],
                            preferred_element_type=jnp.float32)

    @pl.when(pl.program_id(2) == pl.num_programs(2) - 1)
    def _finalize():
        y = acc_ref[...] + shift_ref[...]
        if relu:
            y = jnp.maximum(y, 0.0)
        o_ref[...] = y.astype(o_ref.dtype)


def _matmul_bias_kernel_inplace(x_ref, w_ref, shift_ref, o_ref, *, relu):
    """f32 output: accumulate directly into the resident output block
    (no duplicate TMxTN scratch / extra full-tile copy)."""
    @pl.when(pl.program_id(2) == 0)
    def _init():
        o_ref[...] = jnp.zeros_like(o_ref)

    o_ref[...] += jnp.dot(x_ref[...], w_ref[...],
                          preferred_element_type=jnp.float32)

    @pl.when(pl.program_id(2) == pl.num_programs(2) - 1)
    def _finalize():
        y = o_ref[...] + shift_ref[...]
        if relu:
            y = jnp.maximum(y, 0.0)
        o_ref[...] = y


def pallas_matmul_bias(x, w_p, shift_p, *, n_out, relu, out_dtype,
                       tm=512, tn=256, tk=512):
    """(M, Kp) @ (Kp, Np) with fused bias/shift + optional ReLU.

    `w_p` / `shift_p` are pre-padded (Kp, Np multiples of 128) and pre-cast;
    the per-channel BN scale is already folded into the weight columns.
    Returns (M, n_out) in `out_dtype`.
    """
    M, Kp = x.shape
    Kw, Np = w_p.shape
    assert Kp == Kw and Kp % 128 == 0 and Np % 128 == 0

    TN = _divisor_tile(Np, tn)
    TK = _divisor_tile(Kp, tk)
    TM = min(tm, _round_up(M, 8))
    Mp = _round_up(M, TM)
    # Keep >=2 parallel tiles so both v7x TensorCores get work when the N grid
    # collapses to 1 (the small channel counts cap Np at 128 here).
    if Mp // TM == 1 and Np // TN == 1 and _round_up(M, 8) > 8:
        TM = _round_up(-(-M // 2), 8)
        Mp = _round_up(M, TM)

    if Mp != M:
        x = jnp.pad(x, ((0, Mp - M), (0, 0)))

    grid = (Mp // TM, Np // TN, Kp // TK)
    in_specs = [
        pl.BlockSpec((TM, TK), lambda i, j, k: (i, k)),
        pl.BlockSpec((TK, TN), lambda i, j, k: (k, j)),
        pl.BlockSpec((1, TN), lambda i, j, k: (0, j)),
    ]
    out_spec = pl.BlockSpec((TM, TN), lambda i, j, k: (i, j))
    cparams = pltpu.CompilerParams(
        dimension_semantics=("parallel", "parallel", "arbitrary"),
        vmem_limit_bytes=48 * 1024 * 1024,   # fits v7x's 64 MiB with headroom
    )

    if np.dtype(out_dtype) == np.dtype(np.float32):
        out = pl.pallas_call(
            functools.partial(_matmul_bias_kernel_inplace, relu=relu),
            out_shape=jax.ShapeDtypeStruct((Mp, Np), jnp.float32),
            grid=grid, in_specs=in_specs, out_specs=out_spec,
            compiler_params=cparams,
        )(x, w_p, shift_p)
    else:
        out = pl.pallas_call(
            functools.partial(_matmul_bias_kernel_acc, relu=relu),
            out_shape=jax.ShapeDtypeStruct((Mp, Np), out_dtype),
            grid=grid, in_specs=in_specs, out_specs=out_spec,
            scratch_shapes=[pltpu.VMEM((TM, TN), jnp.float32)],
            compiler_params=cparams,
        )(x, w_p, shift_p)
    return out[:M, :n_out]


# ----------------------------------------------------------------------------
# Glue: NHWC im2col for 3x3 / stride-s / pad-1 convolution, K-padded in place
# ----------------------------------------------------------------------------
def _im2col_3x3_nhwc(x, stride, k_total):
    """x: (B, H, W, C) -> cols (B*Ho*Wo, k_total); feature order (ky, kx, c),
    zero-padded from 9*C up to k_total in the same single materialization."""
    B, H, W, C = x.shape
    Ho = (H + 2 - 3) // stride + 1
    Wo = (W + 2 - 3) // stride + 1
    xp = jnp.pad(x, ((0, 0), (1, 1), (1, 1), (0, 0)))
    taps = []
    for ky in range(3):
        for kx in range(3):
            taps.append(xp[:, ky:ky + (Ho - 1) * stride + 1:stride,
                            kx:kx + (Wo - 1) * stride + 1:stride, :])
    k_pad = k_total - 9 * C
    if k_pad:
        taps.append(jnp.zeros((B, Ho, Wo, k_pad), x.dtype))
    cols = jnp.concatenate(taps, axis=-1)          # (B, Ho, Wo, k_total)
    return cols.reshape(B * Ho * Wo, k_total), Ho, Wo


# ----------------------------------------------------------------------------
# ConvEmbed forward (Pallas hot path) and parameter init
# ----------------------------------------------------------------------------
def conv_embed_forward(params, x, *, compute_dtype=jnp.bfloat16):
    """x: (B, C_in, H, W) NCHW -> (B, num_patches, channels[-1]) f32."""
    h = jnp.transpose(x, (0, 2, 3, 1)).astype(compute_dtype)   # NHWC, cast once
    B = h.shape[0]
    for st in params["stages"]:
        cols, Ho, Wo = _im2col_3x3_nhwc(h, st["stride"], st["w_mat"].shape[0])
        y = pallas_matmul_bias(cols, st["w_mat"], st["shift_p"],
                               n_out=st["cout"], relu=True,
                               out_dtype=compute_dtype)
        h = y.reshape(B, Ho, Wo, st["cout"])
    f = params["final"]
    s = f["stride"]
    hs = h[:, ::s, ::s, :]                         # 1x1 conv, stride s, no pad
    Bf, Ho, Wo, C = hs.shape
    xin = hs.reshape(Bf * Ho * Wo, C)
    kp = f["w_mat"].shape[0]
    if kp != C:
        xin = jnp.pad(xin, ((0, 0), (0, kp - C)))
    y = pallas_matmul_bias(xin, f["w_mat"], f["shift_p"],
                           n_out=f["cout"], relu=False, out_dtype=jnp.float32)
    # NHWC row-major rows == p.flatten(2).transpose(1, 2) of the NCHW output.
    return y.reshape(Bf, Ho * Wo, f["cout"])


def init_conv_embed_params(key, *, channels, strides, in_chans=3,
                           batch_norm=True, compute_dtype=jnp.bfloat16):
    chs = [in_chans] + list(channels)
    n_stages = len(chs) - 2
    keys = iter(jax.random.split(key, 6 * max(n_stages, 1) + 4))
    eps = 1e-5
    stages = []
    for i in range(n_stages):
        cin, cout = chs[i], chs[i + 1]
        w = jax.random.normal(next(keys), (cout, cin, 3, 3), jnp.float32)
        w = w * math.sqrt(2.0 / (cin * 9))
        if batch_norm:
            gamma = 1.0 + 0.1 * jax.random.normal(next(keys), (cout,), jnp.float32)
            beta = 0.1 * jax.random.normal(next(keys), (cout,), jnp.float32)
            mean = 0.1 * jax.random.normal(next(keys), (cout,), jnp.float32)
            var = jnp.abs(1.0 + 0.1 * jax.random.normal(next(keys), (cout,), jnp.float32))
            scale = gamma * jax.lax.rsqrt(var + eps)   # eval-mode BN, no conv bias
            shift = beta - mean * scale
        else:
            scale = jnp.ones((cout,), jnp.float32)
            shift = 0.02 * jax.random.normal(next(keys), (cout,), jnp.float32)
        # (ky, kx, c_in) feature order matches the NHWC im2col columns.
        w_mat = jnp.transpose(w, (2, 3, 1, 0)).reshape(9 * cin, cout)
        # Fold the per-channel scale into the weight columns; pre-pad/pre-cast
        # once so the forward pass does no per-call pad/cast/transpose.
        w_mat = w_mat * scale[None, :]
        Kp = _round_up(9 * cin, 128)
        Np = _round_up(cout, 128)
        stages.append({
            "stride": int(strides[i]),
            "cout": cout,
            "w_oihw": w,            # kept only for the lax.conv reference check
            "scale": scale,
            "shift": shift,
            "w_mat": jnp.pad(w_mat, ((0, Kp - 9 * cin), (0, Np - cout))
                             ).astype(compute_dtype),
            "shift_p": jnp.pad(shift.reshape(1, cout),
                               ((0, 0), (0, Np - cout))).astype(jnp.float32),
        })
    cin, cout = chs[-2], chs[-1]
    wf = jax.random.normal(next(keys), (cout, cin, 1, 1), jnp.float32)
    wf = wf * math.sqrt(1.0 / cin)
    bf = 0.02 * jax.random.normal(next(keys), (cout,), jnp.float32)
    Kp = _round_up(cin, 128)
    Np = _round_up(cout, 128)
    final = {
        "stride": int(strides[-1]),
        "cout": cout,
        "w_oihw": wf,
        "b": bf,
        "w_mat": jnp.pad(wf.reshape(cout, cin).T,
                         ((0, Kp - cin), (0, Np - cout))).astype(compute_dtype),
        "shift_p": jnp.pad(bf.reshape(1, cout),
                           ((0, 0), (0, Np - cout))).astype(jnp.float32),
    }
    return {"stages": stages, "final": final}


# ----------------------------------------------------------------------------
# Pure-JAX reference (lax.conv, f32) for a correctness sanity check
# ----------------------------------------------------------------------------
def conv_embed_reference(params, x):
    h = x
    for st in params["stages"]:
        h = jax.lax.conv_general_dilated(
            h, st["w_oihw"], window_strides=(st["stride"], st["stride"]),
            padding=((1, 1), (1, 1)),
            dimension_numbers=("NCHW", "OIHW", "NCHW"))
        h = h * st["scale"][None, :, None, None] + st["shift"][None, :, None, None]
        h = jnp.maximum(h, 0.0)
    f = params["final"]
    h = jax.lax.conv_general_dilated(
        h, f["w_oihw"], window_strides=(f["stride"], f["stride"]),
        padding="VALID", dimension_numbers=("NCHW", "OIHW", "NCHW"))
    h = h + f["b"][None, :, None, None]
    B, C, Ho, Wo = h.shape
    return jnp.transpose(h.reshape(B, C, Ho * Wo), (0, 2, 1))


# ----------------------------------------------------------------------------
# Demo
# ----------------------------------------------------------------------------
if __name__ == "__main__":
    # Small shapes consistent with the module: images (B, 3, H, W), 3-stage stem.
    B, in_chans, img_size = 2, 3, 32
    channels = [32, 64, 128]          # two 3x3 (BN+ReLU) stages + final 1x1
    strides = [2, 2, 2]
    num_patches = (img_size // int(np.prod(strides))) ** 2   # 16

    key = jax.random.PRNGKey(0)
    k_x, k_p = jax.random.split(key)
    x = jax.random.normal(k_x, (B, in_chans, img_size, img_size), jnp.float32)
    params = init_conv_embed_params(k_p, channels=channels, strides=strides,
                                    in_chans=in_chans, batch_norm=True)

    out = conv_embed_forward(params, x)
    jax.block_until_ready(out)

    assert out.shape == (B, num_patches, channels[-1]), out.shape
    ref = conv_embed_reference(params, x)
    # bf16 operands (f32 accumulation): expect ~1e-2 max abs deviation vs f32.
    max_err = float(jnp.max(jnp.abs(out - ref)))
    assert max_err < 1e-1, f"max abs err vs conv reference: {max_err}"
    print("KERNEL_OK")
</pallas_src>

<mosaic_0001>
module attributes {stable_mosaic.version = 11 : i64} {
  func.func @_matmul_bias_kernel_acc(%arg0: i32, %arg1: i32, %arg2: i32, %arg3: memref<256x128xbf16, #tpu.memory_space<vmem>>, %arg4: memref<128x128xbf16, #tpu.memory_space<vmem>>, %arg5: memref<1x128xf32, #tpu.memory_space<vmem>>, %arg6: memref<256x128xbf16, #tpu.memory_space<vmem>>, %arg7: memref<256x128xf32, #tpu.memory_space<vmem>>) attributes {dimension_semantics = [#tpu.dimension_semantics<parallel>, #tpu.dimension_semantics<parallel>, #tpu.dimension_semantics<arbitrary>], iteration_bounds = array<i64: 2, 1, 1>, scalar_prefetch = 0 : i64, scratch_operands = 1 : i64, tpu.core_type = #tpu.core_type<tc>, window_params = [{transform_indices = @transform_0, window_bounds = array<i64: 256, 128>}, {transform_indices = @transform_1, window_bounds = array<i64: 128, 128>}, {transform_indices = @transform_2, window_bounds = array<i64: 1, 128>}, {transform_indices = @transform_3, window_bounds = array<i64: 256, 128>}]} {
    %c0_i32 = arith.constant 0 : i32
    %0 = arith.cmpi eq, %arg2, %c0_i32 : i32
    %1 = arith.extui %0 : i1 to i32
    %c0_i32_0 = arith.constant 0 : i32
    %2 = arith.cmpi ne, %1, %c0_i32_0 : i32
    scf.if %2 {
      %cst_10 = arith.constant 0.000000e+00 : f32
      %12 = vector.broadcast %cst_10 : f32 to vector<256x128xf32>
      %c0_11 = arith.constant 0 : index
      %c0_12 = arith.constant 0 : index
      %13 = vector.load %arg7[%c0_11, %c0_12] : memref<256x128xf32, #tpu.memory_space<vmem>>, vector<256x128xf32>
      tpu.vector_store %arg7[%c0_11, %c0_12], %12 {strides = array<i32>} : memref<256x128xf32, #tpu.memory_space<vmem>>, vector<256x128xf32>,
    } else {
    }
    %c0 = arith.constant 0 : index
    %c0_1 = arith.constant 0 : index
    %3 = vector.load %arg7[%c0, %c0_1] : memref<256x128xf32, #tpu.memory_space<vmem>>, vector<256x128xf32>
    %c0_2 = arith.constant 0 : index
    %c0_3 = arith.constant 0 : index
    %4 = vector.load %arg3[%c0_2, %c0_3] : memref<256x128xbf16, #tpu.memory_space<vmem>>, vector<256x128xbf16>
    %c0_4 = arith.constant 0 : index
    %c0_5 = arith.constant 0 : index
    %5 = vector.load %arg4[%c0_4, %c0_5] : memref<128x128xbf16, #tpu.memory_space<vmem>>, vector<128x128xbf16>
    %cst = arith.constant dense<0.000000e+00> : vector<256x128xf32>
    %6 = tpu.matmul %4, %5, %cst {dimension_numbers = #tpu.dot_dimension_numbers<[1], [0], [0], [1], [0, 0, 1, 1], [], []>} : vector<256x128xbf16>, vector<128x128xbf16>, vector<256x128xf32> -> vector<256x128xf32>
    %7 = arith.addf %3, %6 : vector<256x128xf32>
    %c0_6 = arith.constant 0 : index
    %c0_7 = arith.constant 0 : index
    %8 = vector.load %arg7[%c0_6, %c0_7] : memref<256x128xf32, #tpu.memory_space<vmem>>, vector<256x128xf32>
    tpu.vector_store %arg7[%c0_6, %c0_7], %7 {strides = array<i32>} : memref<256x128xf32, #tpu.memory_space<vmem>>, vector<256x128xf32>,
    %c0_i32_8 = arith.constant 0 : i32
    %9 = arith.cmpi eq, %arg2, %c0_i32_8 : i32
    %10 = arith.extui %9 : i1 to i32
    %c0_i32_9 = arith.constant 0 : i32
    %11 = arith.cmpi ne, %10, %c0_i32_9 : i32
    scf.if %11 {
      %c0_10 = arith.constant 0 : index
      %c0_11 = arith.constant 0 : index
      %12 = vector.load %arg7[%c0_10, %c0_11] : memref<256x128xf32, #tpu.memory_space<vmem>>, vector<256x128xf32>
      %c0_12 = arith.constant 0 : index
      %c0_13 = arith.constant 0 : index
      %13 = vector.load %arg5[%c0_12, %c0_13] : memref<1x128xf32, #tpu.memory_space<vmem>>, vector<1x128xf32>
      %14 = vector.broadcast %13 : vector<1x128xf32> to vector<256x128xf32>
      %15 = arith.addf %12, %14 : vector<256x128xf32>
      %cst_14 = arith.constant 0.000000e+00 : f32
      %16 = vector.broadcast %cst_14 : f32 to vector<256x128xf32>
      %17 = arith.maximumf %15, %16 : vector<256x128xf32>
      %18 = arith.truncf %17 : vector<256x128xf32> to vector<256x128xbf16>
      %c0_15 = arith.constant 0 : index
      %c0_16 = arith.constant 0 : index
      %19 = vector.load %arg6[%c0_15, %c0_16] : memref<256x128xbf16, #tpu.memory_space<vmem>>, vector<256x128xbf16>
      tpu.vector_store %arg6[%c0_15, %c0_16], %18 {strides = array<i32>} : memref<256x128xbf16, #tpu.memory_space<vmem>>, vector<256x128xbf16>,
    } else {
    }
    return
  }
  func.func @transform_0(%arg0: i32, %arg1: i32, %arg2: i32) -> (i32, i32) {
    %c0_i32 = arith.constant 0 : i32
    return %arg0, %arg2 : i32, i32
  }
  func.func @transform_1(%arg0: i32, %arg1: i32, %arg2: i32) -> (i32, i32) {
    %c0_i32 = arith.constant 0 : i32
    return %arg2, %arg1 : i32, i32
  }
  func.func @transform_2(%arg0: i32, %arg1: i32, %arg2: i32) -> (i32, i32) {
    %c0_i32 = arith.constant 0 : i32
    %c0_i32_0 = arith.constant 0 : i32
    return %c0_i32, %arg1 : i32, i32
  }
  func.func @transform_3(%arg0: i32, %arg1: i32, %arg2: i32) -> (i32, i32) {
    %c0_i32 = arith.constant 0 : i32
    return %arg0, %arg1 : i32, i32
  }
}

</mosaic_0001>

<bundles_post_ra>
// kernel: tpu_custom_call.1
= control target key start
LH: loop header
LB: loop body
LE: loop exit
PB: predicated region body
PF: predicated region fallthrough
CT: control target
= control target key end

     0   :  { %8 = vsyncpa [#allocation4], 0  ;;  %s2006_s0 = inlined_call_operand.hbm [shape: bf16[512,128], index: 0, kind: input, shape index: {}]   ;;  %s2007_s1 = inlined_call_operand.hbm [shape: bf16[128,128], index: 1, kind: input, shape index: {}]   ;;  %s2008_s2 = inlined_call_operand.vmem [shape: f32[1,128], index: 2, kind: input, shape index: {}]   ;;  %s2009_s3 = inlined_call_operand.hbm [shape: bf16[512,128], index: 3, kind: output, shape index: {}]  }
   0x1   :  { %10 = vsyncpa [#allocation4 + $0x1], 0 }
   0x2   :  { %11 = vsyncpa [#allocation7], 0 }
   0x3   :  { %12 = vsyncpa [#allocation5], 0 }
   0x4   :  { %14 = vsyncpa [#allocation5 + $0x1], 0  ;;  %s1703_s12 = smov 0   ;;  %s1705_s13 = smov 0  }
   0x5   :  { %s1707_s14 = smov 0   ;;  %s1709_s15 = smov 0  }
   0x6   :  { %s1711_s16 = smov 0   ;;  %s1713_s17 = smov 0  }
   0x7 LB: > { %s1137_s18 = sadd.s32 4294967295, %s1674_s17   ;;  %s1138_s19 = sadd.s32 4294967294, %s1674_s17   ;;  %s1674_s17 = sphi %s1713_s17, %s20_s17   ;;  %s1670_s16 = sphi %s1711_s16, %s2033_s16   ;;  %s1666_s15 = sphi %s1709_s15, %s2032_s15   ;;  %s1662_s14 = sphi %s1707_s14, %s2031_s14   ;;  %s1658_s13 = sphi %s1705_s13, %s2030_s13   ;;  %s1654_s12 = sphi %s1703_s12, %s2029_s12  }
   0x8   : > { %p61_p0 = scmp.ne.s32.totalorder %s1658_s13, %s1654_s12  ;;  %p1737_p1 = scmp.eq.s32.totalorder %s1137_s18, 0 }
   0x9   : > { %p1741_p2 = scmp.eq.s32.totalorder %s1137_s18, 1  ;;  %p147_p3 = scmp.eq.s32.totalorder %s1138_s19, 1 }
   0xa   : > { %s2014_s20 = scalar_select %p1737_p1, 1, 0 }
   0xb   : > { %s2015_s21 = scalar_select %p1741_p2, 1, 0 }
   0xc   : > { %p1747_p4 = por %p1737_p1, %p61_p0  ;;  %p1139_p5 = scmp.ge.s32.totalorder %s1674_s17, 1 }
   0xd   : > { %p1752_p6 = por %p147_p3, %p61_p0  ;;  %p154_p7 = scmp.lt.s32.totalorder %s1674_s17, 3 }
   0xe   : > { %s2016_s22 = scalar_select %p1747_p4, 1, 0 }
   0xf   : > { %s2017_s23 = scalar_select %p1752_p6, 1, 0 }
  0x10   : > { %p1757_p8 = pnand %p1139_p5, %p154_p7  ;;  %s1676_s25 = smov [#allocation6]  }
  0x11   : > { %s170_s26 = sshll.u32 %s1676_s25, 4  ;;  %s39_s28 = sadd.s32 1, %s1670_s16  ;;  %s171_s26 = int_to_ptr.vmem [resolvable:$true] %s170_s26 }
  0x12   : > { %s2018_s24 = scalar_select %p1757_p8, 1, 0 }
  0x13   : > { %p1437_p9 = pneg %p1757_p8  ;;  %s1530_s4 = scalar_lea.hbm %s2007_s1, 1024 }
  0x14   : > { %p1531_p12 = scmp.ne.s32.totalorder %s2007_s1, %s1530_s4  ;;  %p1537_p5 = scmp.lt.u32.totalorder %s1530_s4, %s2007_s1 }
  0x15   : > { %p1766_p11 = pnand %p1437_p9, %p1737_p1 }
  0x17   : > { %p1532_p13 = pneg %p1766_p11 }
  0x19   : > { %p1533_p0 = pnand %p1532_p13, %p1531_p12 }
  0x1b   : > { %p1534_p3 = pneg %p1533_p0 }
  0x1d   : > { %p1539_p7 = pnand %p1537_p5, %p1534_p3 }
  0x1f   : > { %1542 = shalt.err (!%p1539_p7)
}
  0x20   : > { %s1543_s9 = scalar_lea.vmem %s171_s26, 1024  ;;  %p1551_p1 = scmp.lt.s32.totalorder %s171_s26, %s171_s26 }
  0x21   : > { %p1544_p9 = scmp.ne.s32.totalorder %s171_s26, %s1543_s9  ;;  %p1552_p4 = scmp.lt.s32.totalorder %s1543_s9, %s1543_s9 }
  0x23   : > { %p1546_p10 = pnand %p1544_p9, %p1532_p13  ;;  %p1553_p8 = por %p1552_p4, %p1551_p1 }
  0x25   : > { %p1547_p6 = pneg %p1546_p10 }
  0x27   : > { %p1554_p2 = pnand %p1553_p8, %p1547_p6 }
  0x29   : > { %1557 = shalt.err (!%p1554_p2)
}
  0x2a   : > { %s1677_s10 = smov 64   ;;  %s1678_s11 = smov 4  }
  0x2b   : > { %1440 = dma.hbm_to_vmem [thread:$0]  (!%p1766_p11), %s2007_s1, 1024, %s171_s26, [#allocation7], %s1677_s10, %s1677_s10, %s1678_s11  }
  0x2c   : > { %p41_p1 = scmp.ge.s32.totalorder %s39_s28, 2  ;;  %s48_s25 = sadd.s32 1, %s1662_s14 }
  0x2d   : > { %p55_p2 = scmp.ne.s32.totalorder %s1662_s14, %s1658_s13  ;;  %p56_p4 = scmp.eq.s32.totalorder %s1674_s17, 0 }
  0x2e   : > { %s2035_s28 = smov (%p41_p1, %s39_s28), 0  ;;  %p2021_p8 = scmp.ne.s32.totalorder %s2015_s21, 0 }
  0x2f   : > { %p1796_p6 = por %p56_p4, %p55_p2  ;;  %s43_s30 = ssub.s32 %s1670_s16, %s2035_s28 }
  0x30   : > { %p1802_p10 = por %p2021_p8, %p55_p2  ;;  %p1450_p12 = scmp.lt.s32.totalorder %s1674_s17, 2 }
  0x31   : > { %p46_p11 = scmp.eq.s32.totalorder %s43_s30, 0  ;;  %s190_s26 = sand.u32 1, %s1662_s14  }
  0x32   : > { %s1143_s4 = sshll.u32 %s190_s26, 7  ;;  %s1212_s6 = sshll.u32 %s1670_s16, 11 }
  0x33   : > { %s1811_s5 = scalar_select %p46_p11, %s1662_s14, %s48_s25  }
  0x34   : > { %s1817_s9 = scalar_lea.hbm %s2006_s0, %s1212_s6  ;;  %s194_s21 = scalar_lea.vmem [#allocation3], %s1143_s4 }
  0x35   : > { %s202_s18 = sshll.u32 %s194_s21, 4  ;;  %p1823_p13 = pnand %p1450_p12, %p1796_p6  ;;  %s1819_s18 = int_to_ptr.vmem [resolvable:$true] %s202_s18 }
  0x36   : > { %s1827_s25 = scalar_lea.sflag [#allocation4], %s190_s26  ;;  %s1558_s30 = scalar_lea.hbm %s1817_s9, 2048 }
  0x37   : > { %p1559_p0 = scmp.ne.s32.totalorder %s1817_s9, %s1558_s30  ;;  %p1560_p3 = pneg %p1823_p13 }
  0x38   : > { %s1563_s29 = scalar_lea.hbm %s2006_s0, 4096  ;;  %p1564_p9 = scmp.lt.u32.totalorder %s1817_s9, %s2006_s0 }
  0x39   : > { %p1561_p5 = pnand %p1560_p3, %p1559_p0  ;;  %p1565_p1 = scmp.lt.u32.totalorder %s1563_s29, %s1558_s30 }
  0x3a   : > { %p1567_p4 = scmp.lt.u32.totalorder %s1558_s30, %s1817_s9 }
  0x3b   : > { %p1562_p7 = pneg %p1561_p5  ;;  %p1566_p2 = por %p1565_p1, %p1564_p9 }
  0x3d   : > { %p1568_p6 = por %p1567_p4, %p1566_p2 }
  0x3f   : > { %p1569_p8 = pnand %p1568_p6, %p1562_p7 }
  0x41   : > { %1572 = shalt.err (!%p1569_p8)
}
  0x42   : > { %s1573_s26 = scalar_lea.vmem %s1819_s18, 2048  ;;  %s1679_s21 = smov [#allocation3]  }
  0x43   : > { %p1574_p12 = scmp.ne.s32.totalorder %s1819_s18, %s1573_s26  ;;  %s1578_s4 = sshll.u32 %s1679_s21, 4  ;;  %s1579_s4 = int_to_ptr.vmem [resolvable:$false] %s1578_s4 }
  0x44   : > { %s1580_s6 = scalar_lea.vmem %s1579_s4, 4096  ;;  %p1581_p5 = scmp.lt.s32.totalorder %s1819_s18, %s1579_s4 }
  0x45   : > { %p1576_p11 = pnand %p1574_p12, %p1560_p3  ;;  %p1582_p9 = scmp.lt.s32.totalorder %s1580_s6, %s1573_s26 }
  0x47   : > { %p1577_p0 = pneg %p1576_p11  ;;  %p1583_p1 = por %p1582_p9, %p1581_p5 }
  0x49   : > { %p1584_p2 = pnand %p1583_p1, %p1577_p0 }
  0x4b   : > { %1587 = shalt.err (!%p1584_p2)
}
  0x4c   : > { %1444 = dma.hbm_to_vmem [thread:$0]  (!%p1823_p13), %s1817_s9, 2048, %s1819_s18, %s1827_s25, %s1677_s10, %s1677_s10, %s1678_s11  }
  0x4d   : > { %p2024_p3 = scmp.ne.s32.totalorder %s2018_s24, 0 }
  0x4e   : > { %s1861_s30 = sand.u32 (!%p2024_p3), 1, %s1658_s13   ;;  %p2025_p7 = scmp.ne.s32.totalorder (!%p2024_p3), %s2016_s22, 0 }
  0x4f   : > { %214 = sbr.rel (%p2024_p3) target bundleno = 383 (0x17f), region = 32  ;;  %s1147_s29 = sshll.u32 (!%p2024_p3), %s1861_s30, 7 }
  0x50   : > { %s217_s7 = scalar_lea.sflag (!%p2024_p3), [#allocation4], %s1861_s30  ;;  %s1867_s19 = scalar_lea.vmem (!%p2024_p3), [#allocation3], %s1147_s29 }
  0x56   : > { %1641 = dma.done.wait (%p2025_p7), %s217_s7, 2048  }
  0x57   : > { %1643 = vsyncadd (%p2025_p7), %s217_s7, 4294965248  ;;  %p2026_p13 = scmp.ne.s32.totalorder %s2014_s20, 0 }
  0x59   : > { %1645 = dma.done.wait (%p2026_p13), [#allocation7], 1024  }
  0x5a   : > { %1647 = vsyncadd (%p2026_p13), [#allocation7], 4294966272  ;;  %v1506_v0 = vld [vmem:[#allocation6] sm:$0xff]   ;;  %v1507_v1 = vld [vmem:[#allocation6 + $0x8] sm:$0xff]   ;;  %s1908_s24 = scalar_lea.vmem [#allocation8], %s1147_s29  ;;  %s1245_s10 = sshll.u32 %s1666_s15, 11 }
  0x5b   : > { %1365 = vmatprep.subr.bf16.mxu0 %v1506_v0  ;;  %1413 = vmatprep.subr.bf16.mxu1 %v1506_v0  ;;  %v1508_v2 = vld [vmem:[#allocation6 + $0x10] sm:$0xff]   ;;  %v1509_v3 = vld [vmem:[#allocation6 + $0x18] sm:$0xff]   ;;  %v1514_v4 = vld [vmem:[%s1867_s19] sm:$0xff]   ;;  %s1023_s11 = sshll.u32 %s1908_s24, 4  ;;  %s1951_s15 = scalar_lea.hbm %s2009_s3, %s1245_s10  ;;  %s1953_s11 = int_to_ptr.vmem [resolvable:$true] %s1023_s11 }
  0x5c   : > { %1366 = vmatpush3.bf16.msra.mxu0 %v1506_v0  ;;  %1421 = vmatpush3.bf16.msra.mxu1 %v1506_v0  ;;  %v1515_v5 = vld [vmem:[%s1867_s19 + $0x40] sm:$0xff]   ;;  %v1511_v7 = vld [vmem:[#allocation6 + $0x28] sm:$0xff]   ;;  %v1512_v8 = vld [vmem:[#allocation6 + $0x30] sm:$0xff]   ;;  %s1009_s25 = scalar_lea.sflag [#allocation5], %s1861_s30  ;;  %s1588_s8 = scalar_lea.vmem %s1953_s11, 2048 }
  0x5d   : > { %1367 = vmatprep.subr.bf16.mxu0 %v1507_v1  ;;  %1414 = vmatprep.subr.bf16.mxu1 %v1507_v1  ;;  %v1510_v6 = vld [vmem:[#allocation6 + $0x20] sm:$0xff]   ;;  %v1513_v9 = vld [vmem:[#allocation6 + $0x38] sm:$0xff]   ;;  %v1516_v10 = vld [vmem:[%s1867_s19 + $0x8] sm:$0xff]   ;;  %p1589_p4 = scmp.ne.s32.totalorder %s1953_s11, %s1588_s8  ;;  %s1680_s26 = smov [#allocation8]  }
  0x5e   : > { %1381 = vmatprep.mubr.bf16.mxu0 %v1514_v4  ;;  %1397 = vmatprep.mubr.bf16.mxu1 %v1515_v5  ;;  %v1517_v11 = vld [vmem:[%s1867_s19 + $0x48] sm:$0xff]   ;;  %v1518_v12 = vld [vmem:[%s1867_s19 + $0x10] sm:$0xff]   ;;  %v1520_v14 = vld [vmem:[%s1867_s19 + $0x18] sm:$0xff]   ;;  %s1592_s21 = sshll.u32 %s1680_s26, 4  ;;  %s1593_s21 = int_to_ptr.vmem [resolvable:$false] %s1592_s21 }
  0x5f   : > { %v1519_v13 = vld [vmem:[%s1867_s19 + $0x50] sm:$0xff]   ;;  %v1521_v15 = vld [vmem:[%s1867_s19 + $0x58] sm:$0xff]   ;;  %v1522_v16 = vld [vmem:[%s1867_s19 + $0x20] sm:$0xff]   ;;  %p1590_p6 = pnand %p1589_p4, %p1802_p10  ;;  %s1594_s4 = scalar_lea.vmem %s1593_s21, 4096 }
  0x60   : > { %1368 = vmatpush3.bf16.msra.mxu0 %v1507_v1  ;;  %1422 = vmatpush3.bf16.msra.mxu1 %v1507_v1  ;;  %v1523_v17 = vld [vmem:[%s1867_s19 + $0x60] sm:$0xff]   ;;  %v1524_v18 = vld [vmem:[%s1867_s19 + $0x28] sm:$0xff]   ;;  %v1526_v20 = vld [vmem:[%s1867_s19 + $0x30] sm:$0xff]   ;;  %p1595_p12 = scmp.lt.s32.totalorder %s1953_s11, %s1593_s21  ;;  %p1596_p11 = scmp.lt.s32.totalorder %s1594_s4, %s1588_s8 }
  0x61   : > { %1369 = vmatprep.subr.bf16.mxu0 %v1508_v2  ;;  %1415 = vmatprep.subr.bf16.mxu1 %v1508_v2  ;;  %v1525_v19 = vld [vmem:[%s1867_s19 + $0x68] sm:$0xff]   ;;  %v1527_v21 = vld [vmem:[%s1867_s19 + $0x70] sm:$0xff]   ;;  %v1528_v22 = vld [vmem:[%s1867_s19 + $0x38] sm:$0xff]   ;;  %p1591_p8 = pneg %p1590_p6 }
  0x62   : > { %v1529_v23 = vld [vmem:[%s1867_s19 + $0x78] sm:$0xff]   ;;  %v1896_v24 = vld [vmem:[%s2008_s2] ss:$0 sm:$0xff]  ;;  %p1597_p0 = por %p1596_p11, %p1595_p12 }
  0x64   : > { %1370 = vmatpush3.bf16.msra.mxu0 %v1508_v2  ;;  %1423 = vmatpush3.bf16.msra.mxu1 %v1508_v2  ;;  %p1598_p5 = pnand %p1597_p0, %p1591_p8 }
  0x65   : > { %1371 = vmatprep.subr.bf16.mxu0 %v1509_v3  ;;  %1416 = vmatprep.subr.bf16.mxu1 %v1509_v3 }
  0x68   : > { %1372 = vmatpush3.bf16.msra.mxu0 %v1509_v3  ;;  %1424 = vmatpush3.bf16.msra.mxu1 %v1509_v3 }
  0x69   : > { %1373 = vmatprep.subr.bf16.mxu0 %v1510_v6  ;;  %1417 = vmatprep.subr.bf16.mxu1 %v1510_v6 }
  0x6c   : > { %1374 = vmatpush3.bf16.msra.mxu0 %v1510_v6  ;;  %1425 = vmatpush3.bf16.msra.mxu1 %v1510_v6 }
  0x6d   : > { %1375 = vmatprep.subr.bf16.mxu0 %v1511_v7  ;;  %1418 = vmatprep.subr.bf16.mxu1 %v1511_v7 }
  0x70   : > { %1376 = vmatpush3.bf16.msra.mxu0 %v1511_v7  ;;  %1426 = vmatpush3.bf16.msra.mxu1 %v1511_v7 }
  0x71   : > { %1377 = vmatprep.subr.bf16.mxu0 %v1512_v8  ;;  %1419 = vmatprep.subr.bf16.mxu1 %v1512_v8 }
  0x74   : > { %1378 = vmatpush3.bf16.msra.mxu0 %v1512_v8  ;;  %1427 = vmatpush3.bf16.msra.mxu1 %v1512_v8 }
  0x75   : > { %1379 = vmatprep.subr.bf16.mxu0 %v1513_v9  ;;  %1420 = vmatprep.subr.bf16.mxu1 %v1513_v9 }
  0x78   : > { %1380 = vmatpush3.bf16.msra.mxu0 %v1513_v9  ;;  %1428 = vmatpush3.bf16.msra.mxu1 %v1513_v9 }
  0x7b   : > { %1382 = vmatmul.mubr.bf16.vlgmr.msra.gmra.mrb[0].mxu0 %v1516_v10  ;;  %1398 = vmatmul.mubr.bf16.vlgmr.msra.gmra.mrb[0].mxu1 %v1517_v11 }
  0x7c   : > { %1385 = vmatprep.mubr.bf16.mxu0 %v1518_v12  ;;  %1401 = vmatprep.mubr.bf16.mxu1 %v1519_v13 }
  0x83   : > { %1386 = vmatmul.mubr.bf16.gmra.mrb[4].mxu0 %v1520_v14  ;;  %1402 = vmatmul.mubr.bf16.gmra.mrb[4].mxu1 %v1521_v15 }
  0x84   : > { %1389 = vmatprep.mubr.bf16.mxu0 %v1522_v16  ;;  %1405 = vmatprep.mubr.bf16.mxu1 %v1523_v17 }
  0x8b   : > { %1390 = vmatmul.mubr.bf16.gmra.mrb[8].mxu0 %v1524_v18  ;;  %1406 = vmatmul.mubr.bf16.gmra.mrb[8].mxu1 %v1525_v19 }
  0x8c   : > { %1393 = vmatprep.mubr.bf16.mxu0 %v1526_v20  ;;  %1409 = vmatprep.mubr.bf16.mxu1 %v1527_v21 }
  0x93   : > { %1394 = vmatmul.mubr.bf16.gmra.mrb[12].mxu0 %v1528_v22  ;;  %1410 = vmatmul.mubr.bf16.gmra.mrb[12].mxu1 %v1529_v23 }
 0x14e   : > { %v1383_v25 = vpop.f32.mrb[0].mxu0  ;;  %v1399_v26 = vpop.f32.mrb[0].mxu1 }
 0x14f   : > { %v786_v27 = vadd.f32 %v1383_v25, %v1896_v24  ;;  %v802_v28 = vadd.f32 %v1399_v26, %v1896_v24  ;;  %v551_v29 = vpop.f32.mrb[1].mxu0  ;;  %v615_v30 = vpop.f32.mrb[1].mxu1 }
 0x150   : > { %v784_v31 = vadd.f32 %v1896_v24, %v551_v29  ;;  %v800_v32 = vadd.f32 %v1896_v24, %v615_v30  ;;  %v1384_v33 = vpop.f32.mrb[2].mxu0  ;;  %v1400_v34 = vpop.f32.mrb[2].mxu1 }
 0x151   : > { %v787_v35 = vadd.f32 %v1384_v33, %v1896_v24  ;;  %v803_v36 = vadd.f32 %v1400_v34, %v1896_v24  ;;  %v554_v37 = vpop.f32.mrb[3].mxu0  ;;  %v618_v38 = vpop.f32.mrb[3].mxu1  ;;  %v818_v41 = vmax.f32 %v786_v27, 0.0  ;;  %v834_v42 = vmax.f32 %v802_v28, 0.0 }
 0x152   : > { %v785_v39 = vadd.f32 %v1896_v24, %v554_v37  ;;  %v801_v40 = vadd.f32 %v1896_v24, %v618_v38  ;;  %v816_v45 = vmax.f32 %v784_v31, 0.0  ;;  %v832_v46 = vmax.f32 %v800_v32, 0.0 }
 0x153   : > { %v819_v43 = vmax.f32 %v787_v35, 0.0  ;;  %v835_v44 = vmax.f32 %v803_v36, 0.0 }
 0x154   : > { %v817_v47 = vmax.f32 %v785_v39, 0.0  ;;  %v833_v48 = vmax.f32 %v801_v40, 0.0 }
 0x155   : > { %v1254_v49 = vpack.c.bf16 %v819_v43, %v818_v41  ;;  %v1294_v50 = vpack.c.bf16 %v835_v44, %v834_v42 }
 0x156   : > { %v1249_v51 = vpack.c.bf16 %v817_v47, %v816_v45  ;;  %v1289_v52 = vpack.c.bf16 %v833_v48, %v832_v46  ;;  %v1387_v53 = vpop.f32.mrb[4].mxu0  ;;  %v1403_v54 = vpop.f32.mrb[4].mxu1 }
 0x157   : > { %1326 = vst [vmem:[%s1908_s24 + $0x8] sm:$0xff] %v1254_v49   ;;  %1334 = vst [vmem:[%s1908_s24 + $0x48] sm:$0xff] %v1294_v50   ;;  %v790_v55 = vadd.f32 %v1387_v53, %v1896_v24  ;;  %v806_v56 = vadd.f32 %v1403_v54, %v1896_v24  ;;  %v567_v57 = vpop.f32.mrb[5].mxu0  ;;  %v631_v58 = vpop.f32.mrb[5].mxu1 }
 0x158   : > { %1250 = vst [vmem:[%s1908_s24] sm:$0xff] %v1249_v51   ;;  %1333 = vst [vmem:[%s1908_s24 + $0x40] sm:$0xff] %v1289_v52   ;;  %v788_v59 = vadd.f32 %v1896_v24, %v567_v57  ;;  %v804_v60 = vadd.f32 %v1896_v24, %v631_v58  ;;  %v1388_v61 = vpop.f32.mrb[6].mxu0  ;;  %v1404_v62 = vpop.f32.mrb[6].mxu1 }
 0x159   : > { %v791_v63 = vadd.f32 %v1388_v61, %v1896_v24  ;;  %v807_v0 = vadd.f32 %v1404_v62, %v1896_v24  ;;  %v570_v1 = vpop.f32.mrb[7].mxu0  ;;  %v634_v2 = vpop.f32.mrb[7].mxu1  ;;  %v822_v5 = vmax.f32 %v790_v55, 0.0  ;;  %v838_v6 = vmax.f32 %v806_v56, 0.0 }
 0x15a   : > { %v789_v3 = vadd.f32 %v1896_v24, %v570_v1  ;;  %v805_v4 = vadd.f32 %v1896_v24, %v634_v2  ;;  %v820_v9 = vmax.f32 %v788_v59, 0.0  ;;  %v836_v10 = vmax.f32 %v804_v60, 0.0 }
 0x15b   : > { %v823_v7 = vmax.f32 %v791_v63, 0.0  ;;  %v839_v8 = vmax.f32 %v807_v0, 0.0 }
 0x15c   : > { %v821_v11 = vmax.f32 %v789_v3, 0.0  ;;  %v837_v12 = vmax.f32 %v805_v4, 0.0 }
 0x15d   : > { %v1264_v13 = vpack.c.bf16 %v823_v7, %v822_v5  ;;  %v1304_v14 = vpack.c.bf16 %v839_v8, %v838_v6 }
 0x15e   : > { %v1259_v15 = vpack.c.bf16 %v821_v11, %v820_v9  ;;  %v1299_v16 = vpack.c.bf16 %v837_v12, %v836_v10  ;;  %v1391_v17 = vpop.f32.mrb[8].mxu0  ;;  %v1407_v18 = vpop.f32.mrb[8].mxu1 }
 0x15f   : > { %1328 = vst [vmem:[%s1908_s24 + $0x18] sm:$0xff] %v1264_v13   ;;  %1336 = vst [vmem:[%s1908_s24 + $0x58] sm:$0xff] %v1304_v14   ;;  %v794_v19 = vadd.f32 %v1391_v17, %v1896_v24  ;;  %v810_v20 = vadd.f32 %v1407_v18, %v1896_v24  ;;  %v583_v21 = vpop.f32.mrb[9].mxu0  ;;  %v647_v22 = vpop.f32.mrb[9].mxu1 }
 0x160   : > { %1327 = vst [vmem:[%s1908_s24 + $0x10] sm:$0xff] %v1259_v15   ;;  %1335 = vst [vmem:[%s1908_s24 + $0x50] sm:$0xff] %v1299_v16   ;;  %v792_v23 = vadd.f32 %v1896_v24, %v583_v21  ;;  %v808_v25 = vadd.f32 %v1896_v24, %v647_v22  ;;  %v1392_v26 = vpop.f32.mrb[10].mxu0  ;;  %v1408_v27 = vpop.f32.mrb[10].mxu1 }
 0x161   : > { %v795_v28 = vadd.f32 %v1392_v26, %v1896_v24  ;;  %v811_v29 = vadd.f32 %v1408_v27, %v1896_v24  ;;  %v586_v30 = vpop.f32.mrb[11].mxu0  ;;  %v650_v31 = vpop.f32.mrb[11].mxu1  ;;  %v826_v34 = vmax.f32 %v794_v19, 0.0  ;;  %v842_v35 = vmax.f32 %v810_v20, 0.0 }
 0x162   : > { %v793_v32 = vadd.f32 %v1896_v24, %v586_v30  ;;  %v809_v33 = vadd.f32 %v1896_v24, %v650_v31  ;;  %v824_v38 = vmax.f32 %v792_v23, 0.0  ;;  %v840_v39 = vmax.f32 %v808_v25, 0.0 }
 0x163   : > { %v827_v36 = vmax.f32 %v795_v28, 0.0  ;;  %v843_v37 = vmax.f32 %v811_v29, 0.0 }
 0x164   : > { %v825_v40 = vmax.f32 %v793_v32, 0.0  ;;  %v841_v41 = vmax.f32 %v809_v33, 0.0 }
 0x165   : > { %v1274_v42 = vpack.c.bf16 %v827_v36, %v826_v34  ;;  %v1314_v43 = vpack.c.bf16 %v843_v37, %v842_v35 }
 0x166   : > { %v1269_v44 = vpack.c.bf16 %v825_v40, %v824_v38  ;;  %v1309_v45 = vpack.c.bf16 %v841_v41, %v840_v39  ;;  %v1395_v46 = vpop.f32.mrb[12].mxu0  ;;  %v1411_v47 = vpop.f32.mrb[12].mxu1 }
 0x167   : > { %1330 = vst [vmem:[%s1908_s24 + $0x28] sm:$0xff] %v1274_v42   ;;  %1338 = vst [vmem:[%s1908_s24 + $0x68] sm:$0xff] %v1314_v43   ;;  %v798_v48 = vadd.f32 %v1395_v46, %v1896_v24  ;;  %v814_v49 = vadd.f32 %v1411_v47, %v1896_v24  ;;  %v599_v50 = vpop.f32.mrb[13].mxu0  ;;  %v663_v51 = vpop.f32.mrb[13].mxu1 }
 0x168   : > { %1329 = vst [vmem:[%s1908_s24 + $0x20] sm:$0xff] %v1269_v44   ;;  %1337 = vst [vmem:[%s1908_s24 + $0x60] sm:$0xff] %v1309_v45   ;;  %v796_v52 = vadd.f32 %v1896_v24, %v599_v50  ;;  %v812_v53 = vadd.f32 %v1896_v24, %v663_v51  ;;  %v1396_v54 = vpop.f32.mrb[14].mxu0  ;;  %v1412_v55 = vpop.f32.mrb[14].mxu1 }
 0x169   : > { %v799_v56 = vadd.f32 %v1396_v54, %v1896_v24  ;;  %v815_v57 = vadd.f32 %v1412_v55, %v1896_v24  ;;  %v602_v58 = vpop.f32.mrb[15].mxu0  ;;  %v666_v59 = vpop.f32.mrb[15].mxu1  ;;  %v830_v62 = vmax.f32 %v798_v48, 0.0  ;;  %v846_v63 = vmax.f32 %v814_v49, 0.0 }
 0x16a   : > { %v797_v60 = vadd.f32 %v1896_v24, %v602_v58  ;;  %v813_v61 = vadd.f32 %v1896_v24, %v666_v59  ;;  %v828_v2 = vmax.f32 %v796_v52, 0.0  ;;  %v844_v3 = vmax.f32 %v812_v53, 0.0 }
 0x16b   : > { %v831_v0 = vmax.f32 %v799_v56, 0.0  ;;  %v847_v1 = vmax.f32 %v815_v57, 0.0 }
 0x16c   : > { %v829_v4 = vmax.f32 %v797_v60, 0.0  ;;  %v845_v5 = vmax.f32 %v813_v61, 0.0 }
 0x16d   : > { %v1284_v6 = vpack.c.bf16 %v831_v0, %v830_v62  ;;  %v1324_v7 = vpack.c.bf16 %v847_v1, %v846_v63 }
 0x16e   : > { %v1279_v24 = vpack.c.bf16 %v829_v4, %v828_v2  ;;  %v1319_v8 = vpack.c.bf16 %v845_v5, %v844_v3 }
 0x16f   : > { %1332 = vst [vmem:[%s1908_s24 + $0x38] sm:$0xff] %v1284_v6   ;;  %1340 = vst [vmem:[%s1908_s24 + $0x78] sm:$0xff] %v1324_v7  }
 0x170   : > { %1331 = vst [vmem:[%s1908_s24 + $0x30] sm:$0xff] %v1279_v24   ;;  %1339 = vst [vmem:[%s1908_s24 + $0x70] sm:$0xff] %v1319_v8  }
 0x171   : > { %1601 = shalt.err (!%p1598_p5)
}
 0x172   : > { %s1602_s6 = scalar_lea.hbm %s1951_s15, 2048  ;;  %s1606_s19 = scalar_lea.hbm %s2009_s3, 4096 }
 0x173   : > { %p1603_p9 = scmp.ne.s32.totalorder %s1951_s15, %s1602_s6  ;;  %p1607_p3 = scmp.lt.u32.totalorder %s1951_s15, %s2009_s3 }
 0x174   : > { %p1608_p7 = scmp.lt.u32.totalorder %s1606_s19, %s1602_s6  ;;  %p1610_p4 = scmp.lt.u32.totalorder %s1602_s6, %s1951_s15 }
 0x175   : > { %p1604_p1 = pnand %p1603_p9, %p1802_p10 }
 0x176   : > { %p1609_p13 = por %p1608_p7, %p1607_p3 }
 0x177   : > { %p1605_p2 = pneg %p1604_p1 }
 0x178   : > { %p1611_p6 = por %p1610_p4, %p1609_p13 }
 0x17a   : > { %p1612_p8 = pnand %p1611_p6, %p1605_p2 }
 0x17c   : > { %1615 = shalt.err (!%p1612_p8)
}
 0x17d   : > { %s1681_s24 = smov 64   ;;  %s1682_s10 = smov 4  }
 0x17e   : > { %1435 = dma.vmem_to_hbm [thread:$0]  (%p1802_p10), %s1953_s11, 2048, %s1951_s15, %s1009_s25, %s1681_s24, %s1681_s24, %s1682_s10  }
 0x17f PF: > { %s1038_s9 = sand.u32 1, %s1654_s12   ;;  %p2027_p12 = scmp.ne.s32.totalorder %s2017_s23, 0 }
 0x180   : > { %p2028_p11 = scmp.ge.s32.totalorder %s1674_s17, 2  ;;  %s1039_s18 = scalar_lea.sflag [#allocation5], %s1038_s9 }
 0x182   : > { %p1446_p0 = pnand %p2028_p11, %p2027_p12 }
 0x184   : > { %1649 = dma.done.wait (!%p1446_p0), %s1039_s18, 2048  }
 0x185   : > { %1651 = vsyncadd (!%p1446_p0), %s1039_s18, 4294965248  ;;  %s20_s17 = sadd.s32 1, %s1674_s17   ;;  %s2029_s12 = smov %s1658_s13 }
 0x186   : > { %p17_p5 = scmp.ge.s32.totalorder %s20_s17, 4   ;;  %s2030_s13 = smov %s1662_s14 }
 0x187   : > { %s2031_s14 = smov %s1811_s5  ;;  %s2032_s15 = smov %s1670_s16 }
 0x188   : > { %s2033_s16 = smov %s2035_s28  ;;  %19 = sbr.rel (!%p17_p5) target bundleno = 7 (0x7), region = 93 }
 0x18f   :  { %1044 = vsyncpa [#allocation4], 1 }
 0x190   :  { %1046 = vsyncpa [#allocation4 + $0x1], 1 }
 0x191   :  { %1047 = vsyncpa [#allocation7], 1 }
 0x192   :  { %1048 = vsyncpa [#allocation5], 1 }
 0x193   :  { %1050 = vsyncpa [#allocation5 + $0x1], 1 }

</bundles_post_ra>
